<compile_context>
chip_gen: v5e
topology: v5e:2x2
jax: 0.10.0
libtpu: 0.0.40
codegen_flags: <defaults>
</compile_context>

<pallas_src>
import functools
import math

import jax
import jax.numpy as jnp
from jax.experimental import pallas as pl
from jax.experimental.pallas import tpu as pltpu


def _compute_vmem_limit():
    """Per-generation VMEM budget: ~3/4 of physical, capped at 96 MiB."""
    try:
        cap = int(pltpu.get_tpu_info().vmem_capacity_bytes)
    except Exception:
        cap = 64 * 1024 * 1024  # conservative fallback (v7x physical VMEM)
    return min((cap * 3) // 4, 96 * 1024 * 1024)


_VMEM_LIMIT = _compute_vmem_limit()


def _pick_tile(dim, cap, align):
    """Full dim if it fits, else the largest divisor of `dim` that is a multiple of
    `align` and <= cap.  Never returns an unaligned or oversized block."""
    if dim <= cap:
        return dim  # full-extent block is always a legal block shape
    t = (cap // align) * align
    while t >= align:
        if dim % t == 0:
            return t
        t -= align
    raise ValueError(
        f"dim={dim} has no divisor that is a multiple of {align} and <= {cap}; "
        "pad the input to a friendlier shape.")


def _gelu(y):
    # tanh-approx GELU (EUP tanh slot).
    # TODO(synk): HF BERT uses the exact erf-based GELU; tanh approx differs slightly.
    c = 0.7978845608028654  # sqrt(2/pi)
    return 0.5 * y * (1.0 + jnp.tanh(c * (y + 0.044715 * y * y * y)))


# ----------------------------- linear (QKV projection) -----------------------------
# Full-K blocks: no reduction grid axis, no accumulator scratch, no flush copy.

def _linear_kernel(x_ref, w_ref, b_ref, o_ref):
    y = jnp.dot(x_ref[...], w_ref[...], preferred_element_type=jnp.float32) + b_ref[...]
    o_ref[...] = y.astype(o_ref.dtype)


def linear(x, w, b, *, tm_cap=512, tn_cap=1024):
    """x: (M, K) bf16, w: (K, N) bf16, b: (N,) f32 -> (M, N) bf16."""
    M, K = x.shape
    N = w.shape[1]
    tm = _pick_tile(M, tm_cap, 8)
    tn = _pick_tile(N, tn_cap, 256)   # align to the 256-wide v6e/v7x MXU
    return pl.pallas_call(
        _linear_kernel,
        out_shape=jax.ShapeDtypeStruct((M, N), jnp.bfloat16),
        grid=(M // tm, N // tn),
        in_specs=[
            pl.BlockSpec((tm, K), lambda i, j: (i, 0)),
            pl.BlockSpec((K, tn), lambda i, j: (0, j)),
            pl.BlockSpec((1, tn), lambda i, j: (0, j)),
        ],
        out_specs=pl.BlockSpec((tm, tn), lambda i, j: (i, j)),
        compiler_params=pltpu.CompilerParams(
            dimension_semantics=("parallel", "parallel"),
            vmem_limit_bytes=_VMEM_LIMIT),
    )(x, w, b.reshape(1, N))


# ----------------------------- embedding layernorm (row-tiled) -----------------------------

def _layernorm_kernel(x_ref, g_ref, b_ref, o_ref, *, eps):
    x = x_ref[...].astype(jnp.float32)
    mu = jnp.mean(x, axis=-1, keepdims=True)
    xc = x - mu
    var = jnp.mean(xc * xc, axis=-1, keepdims=True)
    o_ref[...] = ((xc * jax.lax.rsqrt(var + eps)) * g_ref[...] + b_ref[...]).astype(o_ref.dtype)


def layernorm(x, gamma, beta, eps=1e-12, *, tm_cap=1024):
    """x: (M, H) f32 -> (M, H) bf16 (stats in f32)."""
    M, H = x.shape
    tm = _pick_tile(M, tm_cap, 8)
    return pl.pallas_call(
        functools.partial(_layernorm_kernel, eps=eps),
        out_shape=jax.ShapeDtypeStruct((M, H), jnp.bfloat16),
        grid=(M // tm,),
        in_specs=[
            pl.BlockSpec((tm, H), lambda i: (i, 0)),
            pl.BlockSpec((1, H), lambda i: (0, 0)),
            pl.BlockSpec((1, H), lambda i: (0, 0)),
        ],
        out_specs=pl.BlockSpec((tm, H), lambda i: (i, 0)),
        compiler_params=pltpu.CompilerParams(
            dimension_semantics=("parallel",),
            vmem_limit_bytes=_VMEM_LIMIT),
    )(x, gamma.reshape(1, H), beta.reshape(1, H))


# ----------------------------- fused projection + residual + layernorm -----------------------------

def _proj_res_ln_kernel(x_ref, w_ref, b_ref, res_ref, g_ref, bb_ref, o_ref, *, eps):
    y = (jnp.dot(x_ref[...], w_ref[...], preferred_element_type=jnp.float32)
         + b_ref[...] + res_ref[...].astype(jnp.float32))
    mu = jnp.mean(y, axis=-1, keepdims=True)
    yc = y - mu
    var = jnp.mean(yc * yc, axis=-1, keepdims=True)
    o_ref[...] = ((yc * jax.lax.rsqrt(var + eps)) * g_ref[...] + bb_ref[...]).astype(o_ref.dtype)


def proj_residual_layernorm(x, w, b, residual, gamma, beta, eps=1e-12, *, tm_cap=512):
    """LayerNorm((x @ w + b) + residual). x: (M, K) bf16, w: (K, N) bf16 -> (M, N) bf16."""
    M, K = x.shape
    N = w.shape[1]
    tm = _pick_tile(M, tm_cap, 8)
    return pl.pallas_call(
        functools.partial(_proj_res_ln_kernel, eps=eps),
        out_shape=jax.ShapeDtypeStruct((M, N), jnp.bfloat16),
        grid=(M // tm,),
        in_specs=[
            pl.BlockSpec((tm, K), lambda i: (i, 0)),
            pl.BlockSpec((K, N), lambda i: (0, 0)),
            pl.BlockSpec((1, N), lambda i: (0, 0)),
            pl.BlockSpec((tm, N), lambda i: (i, 0)),
            pl.BlockSpec((1, N), lambda i: (0, 0)),
            pl.BlockSpec((1, N), lambda i: (0, 0)),
        ],
        out_specs=pl.BlockSpec((tm, N), lambda i: (i, 0)),
        compiler_params=pltpu.CompilerParams(
            dimension_semantics=("parallel",),
            vmem_limit_bytes=_VMEM_LIMIT),
    )(x, w, b.reshape(1, N), residual, gamma.reshape(1, N), beta.reshape(1, N))


# ----------------------------- fused FFN (GELU) + residual + layernorm -----------------------------

def _ffn_res_ln_kernel(x_ref, w1_ref, b1_ref, w2_ref, b2_ref, g_ref, bb_ref,
                       o_ref, acc_ref, *, eps):
    j = pl.program_id(1)

    @pl.when(j == 0)
    def _():
        acc_ref[...] = jnp.zeros_like(acc_ref)

    # (tm, ti) intermediate lives only in VMEM/vregs — never written to HBM.
    h = jnp.dot(x_ref[...], w1_ref[...], preferred_element_type=jnp.float32) + b1_ref[...]
    h = _gelu(h)
    acc_ref[...] += jnp.dot(h.astype(jnp.bfloat16), w2_ref[...],
                            preferred_element_type=jnp.float32)

    @pl.when(j == pl.num_programs(1) - 1)
    def _():
        y = acc_ref[...] + b2_ref[...] + x_ref[...].astype(jnp.float32)  # residual == FFN input
        mu = jnp.mean(y, axis=-1, keepdims=True)
        yc = y - mu
        var = jnp.mean(yc * yc, axis=-1, keepdims=True)
        o_ref[...] = ((yc * jax.lax.rsqrt(var + eps)) * g_ref[...] + bb_ref[...]).astype(o_ref.dtype)


def ffn_residual_layernorm(x, w1, b1, w2, b2, gamma, beta, eps=1e-12,
                           *, tm_cap=512, ti_cap=1536):
    """LayerNorm(GELU(x@W1+b1)@W2 + b2 + x). x: (M, H) bf16, w1: (H, I), w2: (I, H) bf16."""
    M, H = x.shape
    I = w1.shape[1]
    tm = _pick_tile(M, tm_cap, 8)
    ti = _pick_tile(I, ti_cap, 256)
    return pl.pallas_call(
        functools.partial(_ffn_res_ln_kernel, eps=eps),
        out_shape=jax.ShapeDtypeStruct((M, H), jnp.bfloat16),
        grid=(M // tm, I // ti),
        in_specs=[
            pl.BlockSpec((tm, H), lambda i, j: (i, 0)),
            pl.BlockSpec((H, ti), lambda i, j: (0, j)),
            pl.BlockSpec((1, ti), lambda i, j: (0, j)),
            pl.BlockSpec((ti, H), lambda i, j: (j, 0)),
            pl.BlockSpec((1, H), lambda i, j: (0, 0)),
            pl.BlockSpec((1, H), lambda i, j: (0, 0)),
            pl.BlockSpec((1, H), lambda i, j: (0, 0)),
        ],
        out_specs=pl.BlockSpec((tm, H), lambda i, j: (i, 0)),
        scratch_shapes=[pltpu.VMEM((tm, H), jnp.float32)],
        compiler_params=pltpu.CompilerParams(
            dimension_semantics=("parallel", "arbitrary"),
            vmem_limit_bytes=_VMEM_LIMIT),
    )(x, w1, b1.reshape(1, I), w2, b2.reshape(1, H),
      gamma.reshape(1, H), beta.reshape(1, H))


# ----------------------------- attention (lane-dense, query-tiled) -----------------------------

def _attention_kernel(q_ref, k_ref, v_ref, m_ref, ctx_ref, *rest,
                      num_heads, head_dim, scale, output_attentions):
    probs_ref = rest[0] if output_attentions else None

    # scale hoisted out of the per-head loop: one (tq, H) multiply instead of nH (tq, S).
    q_all = (q_ref[0].astype(jnp.float32) * scale).astype(jnp.bfloat16)   # (tq, H)
    k_all = k_ref[0]                                                      # (S, H) bf16
    v_all = v_ref[0]                                                      # (S, H) bf16
    mask = m_ref[0]                                                       # (1, S) f32 additive

    def one_head(hh):
        lo = hh * head_dim
        qh = q_all[:, lo:lo + head_dim]
        kh = k_all[:, lo:lo + head_dim]
        vh = v_all[:, lo:lo + head_dim]
        # scores / softmax stay in f32 (VPU/EUP); MXU operands are bf16.
        s = jnp.einsum("qd,kd->qk", qh, kh,
                       preferred_element_type=jnp.float32) + mask
        s = s - jnp.max(s, axis=-1, keepdims=True)
        e = jnp.exp(s)
        p = e * pl.reciprocal(jnp.sum(e, axis=-1, keepdims=True), approx=True)
        if probs_ref is not None:
            probs_ref[0, hh] = p.astype(probs_ref.dtype)
        return jnp.dot(p.astype(jnp.bfloat16), vh, preferred_element_type=jnp.float32)

    # store context two heads at a time: 128-lane (unmasked) stores when head_dim=64,
    # and no full nH-way concatenate keeping every head's result live.
    h = 0
    while h < num_heads:
        step = 2 if (h + 1) < num_heads else 1
        parts = [one_head(h + i) for i in range(step)]
        blk = parts[0] if step == 1 else jnp.concatenate(parts, axis=-1)
        ctx_ref[0, :, h * head_dim:(h + step) * head_dim] = blk.astype(ctx_ref.dtype)
        h += step


def attention(q, k, v, add_mask, num_heads, *, output_attentions=True, tq_cap=256):
    """q,k,v: (B, S, H) bf16; add_mask: (B, 1, S) f32 additive.
    Returns context (B, S, H) bf16 and, if output_attentions, probs (B, nH, S, S) bf16."""
    # TODO(synk): for very long sequences also tile the key axis (flash-style, online
    # softmax) instead of keeping full-S K/V blocks resident.
    B, S, H = q.shape
    head_dim = H // num_heads
    scale = 1.0 / math.sqrt(head_dim)
    tq = _pick_tile(S, tq_cap, 8)

    ctx_shape = jax.ShapeDtypeStruct((B, S, H), jnp.bfloat16)
    ctx_spec = pl.BlockSpec((1, tq, H), lambda b, qi: (b, qi, 0))
    if output_attentions:
        out_shape = (ctx_shape,
                     jax.ShapeDtypeStruct((B, num_heads, S, S), jnp.bfloat16))
        out_specs = (ctx_spec,
                     pl.BlockSpec((1, num_heads, tq, S), lambda b, qi: (b, 0, qi, 0)))
    else:
        out_shape = ctx_shape
        out_specs = ctx_spec

    return pl.pallas_call(
        functools.partial(_attention_kernel, num_heads=num_heads, head_dim=head_dim,
                          scale=scale, output_attentions=output_attentions),
        out_shape=out_shape,
        grid=(B, S // tq),
        in_specs=[
            pl.BlockSpec((1, tq, H), lambda b, qi: (b, qi, 0)),
            pl.BlockSpec((1, S, H), lambda b, qi: (b, 0, 0)),
            pl.BlockSpec((1, S, H), lambda b, qi: (b, 0, 0)),
            pl.BlockSpec((1, 1, S), lambda b, qi: (b, 0, 0)),
        ],
        out_specs=out_specs,
        compiler_params=pltpu.CompilerParams(
            dimension_semantics=("parallel", "parallel"),
            vmem_limit_bytes=_VMEM_LIMIT),
    )(q, k, v, add_mask)


# ----------------------------- model glue -----------------------------

def bert_layer(x, lp, add_mask, num_heads, output_attentions=True):
    """One BERT encoder layer. x: (B, S, H) bf16."""
    B, S, H = x.shape
    x2 = x.reshape(B * S, H)

    # fused Q|K|V projection: one (H, 3H) bf16 matmul, x read from HBM once.
    qkv = linear(x2, lp["qkv_w"], lp["qkv_b"]).reshape(B, S, 3 * H)
    q = qkv[..., :H]
    k = qkv[..., H:2 * H]
    v = qkv[..., 2 * H:]

    if output_attentions:
        ctx, probs = attention(q, k, v, add_mask, num_heads, output_attentions=True)
    else:
        ctx = attention(q, k, v, add_mask, num_heads, output_attentions=False)
        probs = None
    ctx2 = ctx.reshape(B * S, H)

    # attention output projection + residual + LayerNorm (fused)
    h = proj_residual_layernorm(ctx2, lp["o_w"], lp["o_b"], x2,
                                lp["ln1_g"], lp["ln1_b"])

    # FFN (GELU) + residual + LayerNorm (fused); (M, inter) never hits HBM
    h = ffn_residual_layernorm(h, lp["i_w"], lp["i_b"], lp["out_w"], lp["out_b"],
                               lp["ln2_g"], lp["ln2_b"])

    return h.reshape(B, S, H), probs


def bert_classifier_forward(params, input_ids, attention_mask, token_type_ids,
                            *, num_heads, output_attentions=True):
    B, S = input_ids.shape
    H = params["word_emb"].shape[1]

    # embedding gathers stay in XLA (data-dependent gather would need manual DMA)
    pos_ids = jnp.arange(S)[None, :]
    emb = (jnp.take(params["word_emb"], input_ids, axis=0)
           + jnp.take(params["pos_emb"], pos_ids, axis=0)
           + jnp.take(params["type_emb"], token_type_ids, axis=0))
    x = layernorm(emb.reshape(B * S, H),
                  params["emb_ln_g"], params["emb_ln_b"]).reshape(B, S, H)   # bf16

    # HF-style extended additive attention mask, shape (B, 1, S)
    add_mask = ((1.0 - attention_mask.astype(jnp.float32)) * -10000.0)[:, None, :]

    attns = []
    for lp in params["layers"]:
        x, probs = bert_layer(x, lp, add_mask, num_heads,
                              output_attentions=output_attentions)
        if output_attentions:
            attns.append(probs)

    h_cls = x[:, 0].astype(jnp.float32)                              # (B, H)
    # tiny head (num_classes << 128 lanes): plain XLA per perf review
    logits = h_cls @ params["cls_w"] + params["cls_b"]               # (B, num_classes)
    return logits, tuple(attns)


# ----------------------------- deterministic params -----------------------------

def init_params(key, *, vocab, hidden, heads, layers, inter, max_pos, n_classes):
    def nrm(k, shape, dtype=jnp.float32):
        return (0.02 * jax.random.normal(k, shape)).astype(dtype)

    keys = iter(jax.random.split(key, 6 + layers * 6))
    p = {
        "word_emb": nrm(next(keys), (vocab, hidden)),
        "pos_emb": nrm(next(keys), (max_pos, hidden)),
        "type_emb": nrm(next(keys), (2, hidden)),
        "emb_ln_g": jnp.ones((hidden,), jnp.float32),
        "emb_ln_b": jnp.zeros((hidden,), jnp.float32),
        "layers": [],
        "cls_w": nrm(next(keys), (hidden, n_classes)),
        "cls_b": jnp.zeros((n_classes,), jnp.float32),
    }
    for _ in range(layers):
        lp = {
            # fused Q|K|V weight: (H, 3H), stored bf16 (MXU operands are bf16 anyway)
            "qkv_w": nrm(next(keys), (hidden, 3 * hidden), jnp.bfloat16),
            "qkv_b": jnp.zeros((3 * hidden,), jnp.float32),
            "o_w": nrm(next(keys), (hidden, hidden), jnp.bfloat16),
            "o_b": jnp.zeros((hidden,), jnp.float32),
            "ln1_g": jnp.ones((hidden,), jnp.float32),
            "ln1_b": jnp.zeros((hidden,), jnp.float32),
            "i_w": nrm(next(keys), (hidden, inter), jnp.bfloat16),
            "i_b": jnp.zeros((inter,), jnp.float32),
            "out_w": nrm(next(keys), (inter, hidden), jnp.bfloat16),
            "out_b": jnp.zeros((hidden,), jnp.float32),
            "ln2_g": jnp.ones((hidden,), jnp.float32),
            "ln2_b": jnp.zeros((hidden,), jnp.float32),
        }
        p["layers"].append(lp)
    return p


# ----------------------------- main -----------------------------

if __name__ == "__main__":
    # small, BERT-shaped config
    VOCAB, HIDDEN, HEADS, LAYERS, INTER, MAX_POS, NUM_CLASSES = 64, 32, 2, 2, 64, 16, 4
    B, S = 2, 8

    key = jax.random.PRNGKey(0)
    pkey, ikey = jax.random.split(key)
    params = init_params(pkey, vocab=VOCAB, hidden=HIDDEN, heads=HEADS,
                         layers=LAYERS, inter=INTER, max_pos=MAX_POS,
                         n_classes=NUM_CLASSES)

    input_ids = jax.random.randint(ikey, (B, S), 0, VOCAB, dtype=jnp.int32)
    attention_mask = jnp.ones((B, S), dtype=jnp.int32).at[1, 6:].set(0)
    token_type_ids = jnp.zeros((B, S), dtype=jnp.int32).at[:, 4:].set(1)

    # TODO(synk): pretrained-checkpoint loading (loadPretrainedBERT / loadFinetunedBERTmlm)
    # has no Pallas equivalent; weights are synthetic & deterministic here.
    logits, attn = bert_classifier_forward(
        params, input_ids, attention_mask, token_type_ids, num_heads=HEADS)

    jax.block_until_ready(logits)
    for a in attn:
        jax.block_until_ready(a)

    assert logits.shape == (B, NUM_CLASSES)
    assert len(attn) == LAYERS and attn[0].shape == (B, HEADS, S, S)
    assert bool(jnp.all(jnp.isfinite(logits)))
    print("KERNEL_OK")
</pallas_src>

<mosaic_0001>
module attributes {stable_mosaic.version = 11 : i64} {
  func.func @_layernorm_kernel(%arg0: i32, %arg1: memref<16x32xf32, #tpu.memory_space<vmem>>, %arg2: memref<1x32xf32, #tpu.memory_space<vmem>>, %arg3: memref<1x32xf32, #tpu.memory_space<vmem>>, %arg4: memref<16x32xbf16, #tpu.memory_space<vmem>>) attributes {dimension_semantics = [#tpu.dimension_semantics<parallel>], iteration_bounds = array<i64: 1>, scalar_prefetch = 0 : i64, scratch_operands = 0 : i64, tpu.core_type = #tpu.core_type<tc>, window_params = [{transform_indices = @transform_0, window_bounds = array<i64: 16, 32>}, {pipeline_mode = #tpu.pipeline_mode<synchronous>, transform_indices = @transform_1, window_bounds = array<i64: 1, 32>}, {pipeline_mode = #tpu.pipeline_mode<synchronous>, transform_indices = @transform_2, window_bounds = array<i64: 1, 32>}, {transform_indices = @transform_3, window_bounds = array<i64: 16, 32>}]} {
    %c0 = arith.constant 0 : index
    %c0_0 = arith.constant 0 : index
    %0 = vector.load %arg1[%c0, %c0_0] : memref<16x32xf32, #tpu.memory_space<vmem>>, vector<16x32xf32>
    %cst = arith.constant dense<0.000000e+00> : vector<16xf32>
    %1 = vector.multi_reduction <add>, %0, %cst [1] : vector<16x32xf32> to vector<16xf32>
    %2 = vector.shape_cast %1 : vector<16xf32> to vector<16x1xf32>
    %cst_1 = arith.constant 3.200000e+01 : f32
    %3 = vector.broadcast %cst_1 : f32 to vector<16x1xf32>
    %4 = arith.divf %2, %3 : vector<16x1xf32>
    %5 = vector.broadcast %4 : vector<16x1xf32> to vector<16x32xf32>
    %6 = arith.subf %0, %5 : vector<16x32xf32>
    %7 = arith.mulf %6, %6 : vector<16x32xf32>
    %cst_2 = arith.constant dense<0.000000e+00> : vector<16xf32>
    %8 = vector.multi_reduction <add>, %7, %cst_2 [1] : vector<16x32xf32> to vector<16xf32>
    %9 = vector.shape_cast %8 : vector<16xf32> to vector<16x1xf32>
    %cst_3 = arith.constant 3.200000e+01 : f32
    %10 = vector.broadcast %cst_3 : f32 to vector<16x1xf32>
    %11 = arith.divf %9, %10 : vector<16x1xf32>
    %cst_4 = arith.constant 9.99999996E-13 : f32
    %12 = vector.broadcast %cst_4 : f32 to vector<16x1xf32>
    %13 = arith.addf %11, %12 : vector<16x1xf32>
    %14 = math.rsqrt %13 : vector<16x1xf32>
    %15 = vector.broadcast %14 : vector<16x1xf32> to vector<16x32xf32>
    %16 = arith.mulf %6, %15 : vector<16x32xf32>
    %c0_5 = arith.constant 0 : index
    %c0_6 = arith.constant 0 : index
    %17 = vector.load %arg2[%c0_5, %c0_6] : memref<1x32xf32, #tpu.memory_space<vmem>>, vector<1x32xf32>
    %18 = vector.broadcast %17 : vector<1x32xf32> to vector<16x32xf32>
    %19 = arith.mulf %16, %18 : vector<16x32xf32>
    %c0_7 = arith.constant 0 : index
    %c0_8 = arith.constant 0 : index
    %20 = vector.load %arg3[%c0_7, %c0_8] : memref<1x32xf32, #tpu.memory_space<vmem>>, vector<1x32xf32>
    %21 = vector.broadcast %20 : vector<1x32xf32> to vector<16x32xf32>
    %22 = arith.addf %19, %21 : vector<16x32xf32>
    %23 = arith.truncf %22 : vector<16x32xf32> to vector<16x32xbf16>
    %c0_9 = arith.constant 0 : index
    %c0_10 = arith.constant 0 : index
    %24 = vector.load %arg4[%c0_9, %c0_10] : memref<16x32xbf16, #tpu.memory_space<vmem>>, vector<16x32xbf16>
    tpu.vector_store %arg4[%c0_9, %c0_10], %23 {strides = array<i32>} : memref<16x32xbf16, #tpu.memory_space<vmem>>, vector<16x32xbf16>,
    return
  }
  func.func @transform_0(%arg0: i32) -> (i32, i32) {
    %c0_i32 = arith.constant 0 : i32
    %c0_i32_0 = arith.constant 0 : i32
    return %arg0, %c0_i32 : i32, i32
  }
  func.func @transform_1(%arg0: i32) -> (i32, i32) {
    %c0_i32 = arith.constant 0 : i32
    %c0_i32_0 = arith.constant 0 : i32
    %c0_i32_1 = arith.constant 0 : i32
    return %c0_i32, %c0_i32_0 : i32, i32
  }
  func.func @transform_2(%arg0: i32) -> (i32, i32) {
    %c0_i32 = arith.constant 0 : i32
    %c0_i32_0 = arith.constant 0 : i32
    %c0_i32_1 = arith.constant 0 : i32
    return %c0_i32, %c0_i32_0 : i32, i32
  }
  func.func @transform_3(%arg0: i32) -> (i32, i32) {
    %c0_i32 = arith.constant 0 : i32
    %c0_i32_0 = arith.constant 0 : i32
    return %arg0, %c0_i32 : i32, i32
  }
}

</mosaic_0001>

<bundles_post_ra>
// kernel: tpu_custom_call.1
= control target key start
LH: loop header
LB: loop body
LE: loop exit
PB: predicated region body
PF: predicated region fallthrough
CT: control target
= control target key end

     0   :  { %8 = vsyncpa [#allocation3], 0  ;;  %s274_s0 = inlined_call_operand.hbm [shape: f32[16,32], index: 0, kind: input, shape index: {}]   ;;  %s275_s1 = inlined_call_operand.hbm [shape: f32[1,32], index: 1, kind: input, shape index: {}]   ;;  %s276_s2 = inlined_call_operand.vmem [shape: f32[1,32], index: 2, kind: input, shape index: {}]   ;;  %s277_s3 = inlined_call_operand.hbm [shape: bf16[16,32], index: 3, kind: output, shape index: {}]  }
   0x1   :  { %9 = vsyncpa [#allocation6], 0 }
   0x2   :  { %10 = vsyncpa [#allocation4], 0  ;;  %s15_s14 = sshll.u32 %s274_s0, 4  ;;  %s230_s15 = smov [#allocation2]   ;;  %s16_s14 = int_to_ptr.hbm [resolvable:$true] %s15_s14 }
   0x3   :  { %s17_s16 = sshll.u32 %s230_s15, 4  ;;  %s29_s19 = sshll.u32 %s275_s1, 4  ;;  %s18_s16 = int_to_ptr.vmem [resolvable:$true] %s17_s16  ;;  %s30_s19 = int_to_ptr.hbm [resolvable:$true] %s29_s19 }
   0x4   :  { %s231_s20 = smov 128   ;;  %s232_s21 = smov 8  }
   0x5   :  { %23 = dma.hbm_to_vmem [thread:$0]  %s16_s14, 256, %s18_s16, [#allocation3], %s231_s20, %s231_s20, %s232_s21  }
   0x6   :  { %s233_s22 = smov [#allocation5]  }
   0x7   :  { %s31_s23 = sshll.u32 %s233_s22, 4  ;;  %s32_s23 = int_to_ptr.vmem [resolvable:$true] %s31_s23 }
   0x8   :  { %34 = dma.hbm_to_vmem [thread:$0]  %s30_s19, 16, %s32_s23, [#allocation6]  }
   0x9   :  { %224 = dma.done.wait [#allocation3], 256  }
   0xa   :  { %225 = vsyncadd [#allocation3], 4294967040 }
   0xb   :  { %226 = dma.done.wait [#allocation6], 16  }
   0xc   :  { %227 = vsyncadd [#allocation6], 4294967280  ;;  %vm47_vm0 = vcmask 261120   ;;  %v45_v0 = vld [vmem:[#allocation2] sm:$0xff]  ;;  %v46_v2 = vld [vmem:[#allocation2 + $0x8] sm:$0xff]  ;;  %v234_v4 = vmov 32.0  }
   0xd   :  { %v48_v1 = vsel %vm47_vm0, %v45_v0, 0.0  ;;  %v51_v3 = vsel %vm47_vm0, %v46_v2, 0.0  ;;  %146 = vrcp.f32 %v234_v4  ;;  %v144_v35 = vld [vmem:[#allocation5] ss:$0 sm:$0xff]  ;;  %v145_v38 = vld [vmem:[%s276_s2] ss:$0 sm:$0xff] }
   0xe   :  { %49 = vadd.xlane.f32.xlu0 %v48_v1  ;;  %vm113_vm7 = vcmask 257024   ;;  %s235_s24 = smov [#allocation7]   ;;  %s122_s2 = sshll.u32 %s277_s3, 4  ;;  %s123_s2 = int_to_ptr.hbm [resolvable:$true] %s122_s2 }
   0xf   :  { %s120_s25 = sshll.u32 %s235_s24, 4  ;;  %s236_s28 = smov 64   ;;  %s121_s25 = int_to_ptr.vmem [resolvable:$true] %s120_s25 }
  0x10   :  { %s237_s29 = smov 4  }
  0x13   :  { %v147_v5 = vpop.eup %146 }
  0x14   :  { %v55_v6 = vmul.f32 32.0, %v147_v5  ;;  %vm59_vm1 = vweird.f32 %v147_v5 }
  0x16   :  { %52 = vadd.xlane.f32.xlu0 %v51_v3  ;;  %v56_v7 = vsub.f32 1.0, %v55_v6 }
  0x18   :  { %v57_v8 = vmul.f32 %v147_v5, %v56_v7 }
  0x1a   :  { %v58_v9 = vadd.f32 %v147_v5, %v57_v8 }
  0x1c   :  { %v60_v10 = vsel %vm59_vm1, %v147_v5, %v58_v9 }
  0x81   :  { %v50_v11 = vpop.xlane.xlu0 %49 }
  0x82   :  { %v61_v12 = vmul.f32 %v60_v10, %v50_v11 }
  0x84   :  { %v63_v13 = vsub.f32 %v45_v0, %v61_v12 }
  0x86   :  { %v65_v14 = vmul.f32 %v63_v13, %v63_v13 }
  0x88   :  { %v67_v15 = vsel %vm47_vm0, %v65_v14, 0.0 }
  0x89   :  { %68 = vadd.xlane.f32.xlu1 %v67_v15  ;;  %v53_v16 = vpop.xlane.xlu0 %52 }
  0x8a   :  { %v62_v17 = vmul.f32 %v60_v10, %v53_v16 }
  0x8c   :  { %v64_v18 = vsub.f32 %v46_v2, %v62_v17 }
  0x8e   :  { %v66_v19 = vmul.f32 %v64_v18, %v64_v18 }
  0x90   :  { %v70_v20 = vsel %vm47_vm0, %v66_v19, 0.0 }
  0x91   :  { %71 = vadd.xlane.f32.xlu1 %v70_v20 }
  0xfc   :  { %v69_v21 = vpop.xlane.xlu1 %68 }
  0xfd   :  { %v73_v22 = vmul.f32 %v69_v21, %v60_v10 }
  0xff   :  { %v75_v23 = vadd.f32 1e-12, %v73_v22 }
 0x101   :  { %148 = vrsqrt.f32 %v75_v23  ;;  %vm83_vm3 = vweird.f32 %v75_v23 }
 0x104   :  { %v72_v24 = vpop.xlane.xlu1 %71 }
 0x105   :  { %v74_v25 = vmul.f32 %v72_v24, %v60_v10 }
 0x107   :  { %v149_v26 = vpop.eup %148  ;;  %v76_v27 = vadd.f32 1e-12, %v74_v25 }
 0x108   :  { %v78_v28 = vmul.f32 %v149_v26, %v75_v23  ;;  %vm84_vm2 = vweird.f32 %v149_v26 }
 0x109   :  { %150 = vrsqrt.f32 %v76_v27  ;;  %vm85_vm4 = vmor %vm83_vm3, %vm84_vm2  ;;  %vm93_vm6 = vweird.f32 %v76_v27 }
 0x10a   :  { %v79_v29 = vmul.f32 %v149_v26, %v78_v28 }
 0x10c   :  { %v80_v30 = vmul.f32 0.5, %v79_v29 }
 0x10e   :  { %v81_v31 = vsub.f32 1.5, %v80_v30 }
 0x10f   :  { %v151_v32 = vpop.eup %150 }
 0x110   :  { %v82_v33 = vmul.f32 %v149_v26, %v81_v31  ;;  %v88_v34 = vmul.f32 %v151_v32, %v76_v27  ;;  %vm94_vm5 = vweird.f32 %v151_v32 }
 0x111   :  { %vm95_vm8 = vmor %vm93_vm6, %vm94_vm5 }
 0x112   :  { %v86_v36 = vsel %vm85_vm4, %v149_v26, %v82_v33  ;;  %v89_v37 = vmul.f32 %v151_v32, %v88_v34 }
 0x113   :  { %v97_v39 = vmul.f32 %v86_v36, %v63_v13 }
 0x114   :  { %v90_v40 = vmul.f32 0.5, %v89_v37 }
 0x115   :  { %v103_v41 = vmul.f32 %v144_v35, %v97_v39 }
 0x116   :  { %v91_v42 = vsub.f32 1.5, %v90_v40 }
 0x117   :  { %v109_v43 = vadd.f32 %v145_v38, %v103_v41 }
 0x118   :  { %v92_v44 = vmul.f32 %v151_v32, %v91_v42 }
 0x119   :  { %v111_v45 = vpack.c.bf16 %v109_v43, %v109_v43 }
 0x11a   :  { %v96_v46 = vsel %vm95_vm8, %v151_v32, %v92_v44 }
 0x11b   :  { %v98_v47 = vmul.f32 %v96_v46, %v64_v18  ;;  %114 = vst.msk [vmem:[#allocation7] sm:$0xf] %vm113_vm7, %v111_v45 }
 0x11d   :  { %v104_v48 = vmul.f32 %v144_v35, %v98_v47 }
 0x11f   :  { %v110_v49 = vadd.f32 %v145_v38, %v104_v48 }
 0x121   :  { %v112_v50 = vpack.c.bf16 %v110_v49, %v110_v49 }
 0x123   :  { %115 = vst.msk [vmem:[#allocation7 + $0x4] sm:$0xf] %vm113_vm7, %v112_v50 }
 0x124   :  { %128 = dma.vmem_to_hbm [thread:$0]  %s121_s25, 128, %s123_s2, [#allocation4], %s236_s28, %s236_s28, %s237_s29  }
 0x125   :  { %228 = dma.done.wait [#allocation4], 128  }
 0x126   :  { %229 = vsyncadd [#allocation4], 4294967168 }
 0x127   :  { %133 = vsyncpa [#allocation3], 1 }
 0x128   :  { %134 = vsyncpa [#allocation6], 1 }
 0x129   :  { %135 = vsyncpa [#allocation4], 1 }

</bundles_post_ra>
